<compile_context>
chip_gen: v6e
topology: v6e:2x2x1
jax: 0.10.0
libtpu: 0.0.40
codegen_flags: <defaults>
</compile_context>

<pallas_src>
import jax
import jax.numpy as jnp
from jax import lax
from jax.experimental import pallas as pl
from jax.experimental.pallas import tpu as pltpu

SUB = 8       # bias tile rows (one sublane tile)
LANE = 128    # lane tile width

L1, L2, L3, L4 = 8, 16, 16, 4   # NetConfig
NEG_SLOPE = 0.01                # F.leaky_relu default
NORM_EPS = 1e-12                # F.normalize default

# Disjoint activation bands inside the packed 128-lane tiles.
H1_OFF = 0    # fc1 output band: lanes [0, 16)
H2_OFF = 16   # fc2 output band: lanes [16, 32)
OUT_OFF = 0   # fc3 output band: lanes [0, 4)  (lane-dense logits)


def _leaky_relu(h):
    return jnp.where(h > 0, h, NEG_SLOPE * h)


def reinforce_net_kernel(x_ref, w1_ref, w23_ref, b_ref, o_ref):
    x = x_ref[...]          # (TM, 8)   one tile of states
    w1 = w1_ref[...]        # (8, 128)  fc1 weights -> lanes [0, 16)
    w23 = w23_ref[...]      # (128,128) fc2: rows [0,16) -> lanes [16,32)
                            #           fc3: rows [16,32) -> lanes [0,4)
    b = b_ref[...]          # (8, 128)  row 0 = b1, row 1 = b2, row 2 = b3

    # F.normalize(x, dim=0) per state row: x / max(||x||, eps), done as a
    # single rsqrt (EUP) instead of sqrt + divide.
    sq = jnp.sum(x * x, axis=-1, keepdims=True)
    xn = x * lax.rsqrt(jnp.maximum(sq, NORM_EPS * NORM_EPS))

    b1 = b[0:1, :]          # nonzero only in lanes [0, 16)
    b2 = b[1:2, :]          # nonzero only in lanes [16, 32)
    b3 = b[2:3, :]          # nonzero only in lanes [0, 4)

    # Zero lanes propagate exactly (leaky_relu(0) == 0), so the disjoint
    # bands of the packed weight tile never mix between layers.
    h1 = _leaky_relu(jnp.dot(xn, w1, preferred_element_type=jnp.float32) + b1)
    h2 = _leaky_relu(jnp.dot(h1, w23, preferred_element_type=jnp.float32) + b2)
    logits = jnp.dot(h2, w23, preferred_element_type=jnp.float32) + b3

    # Softmax over the 4 valid logits (lanes [0, 4)); exact division so the
    # action probabilities sum to 1 at fp32 precision.
    z = logits[:, OUT_OFF:OUT_OFF + L4]                 # (TM, 4)
    m = jnp.max(z, axis=-1, keepdims=True)
    e = jnp.exp(z - m)
    s = jnp.sum(e, axis=-1, keepdims=True)
    o_ref[...] = e / s
    # TODO(synk): for very large rollout batches on v5e, packing 32 states'
    # logits into one 128-lane row before exp would cut EUP work another 32x.


def pack_params(params):
    """One-time packing of the six Linear params into three resident tiles.

    Call once at init / after a parameter update, NOT per forward step.
    """
    w1, b1, w2, b2, w3, b3 = params
    w1p = jnp.zeros((L1, LANE), jnp.float32)
    w1p = w1p.at[:, H1_OFF:H1_OFF + L2].set(w1.T)                      # (8,16)

    w23p = jnp.zeros((LANE, LANE), jnp.float32)
    w23p = w23p.at[H1_OFF:H1_OFF + L2, H2_OFF:H2_OFF + L3].set(w2.T)   # (16,16)
    w23p = w23p.at[H2_OFF:H2_OFF + L3, OUT_OFF:OUT_OFF + L4].set(w3.T) # (16,4)

    bp = jnp.zeros((SUB, LANE), jnp.float32)
    bp = bp.at[0, H1_OFF:H1_OFF + L2].set(b1)
    bp = bp.at[1, H2_OFF:H2_OFF + L3].set(b2)
    bp = bp.at[2, OUT_OFF:OUT_OFF + L4].set(b3)
    return w1p, w23p, bp


def _batch_tile(batch):
    """256-512 rows/step amortizes per-step overhead; keep >=2 grid steps
    (when batch allows) so the 'parallel' axis can use both v7x TCs."""
    half = -(-batch // 2)                       # cdiv(B, 2)
    return int(min(512, max(8, ((half + 7) // 8) * 8)))


@jax.jit
def lunar_lander_reinforce_forward(x, w1p, w23p, bp):
    """x: (B, 8) LunarLander states -> (B, 4) action probabilities."""
    B = x.shape[0]
    tm = _batch_tile(B)
    bpad = -(-B // tm) * tm
    if bpad != B:
        x = jnp.pad(x, ((0, bpad - B), (0, 0)))

    out = pl.pallas_call(
        reinforce_net_kernel,
        out_shape=jax.ShapeDtypeStruct((bpad, L4), jnp.float32),
        grid_spec=pltpu.PrefetchScalarGridSpec(
            num_scalar_prefetch=0,
            grid=(bpad // tm,),
            in_specs=[
                pl.BlockSpec((tm, L1), lambda i: (i, 0)),      # states (streamed)
                pl.BlockSpec((L1, LANE), lambda i: (0, 0)),    # fc1 weights (resident)
                pl.BlockSpec((LANE, LANE), lambda i: (0, 0)),  # fc2+fc3 weights (resident)
                pl.BlockSpec((SUB, LANE), lambda i: (0, 0)),   # biases (resident)
            ],
            out_specs=pl.BlockSpec((tm, L4), lambda i: (i, 0)),
        ),
        compiler_params=pltpu.CompilerParams(
            dimension_semantics=("parallel",),   # batch tiles shard across v7x TCs
        ),
    )(x, w1p, w23p, bp)
    return out[:B]


def init_params(key):
    """Deterministic init mirroring nn.Linear: U(-1/sqrt(fan_in), 1/sqrt(fan_in))."""
    ks = jax.random.split(key, 6)

    def linear(kw, kb, fan_in, fan_out):
        bound = 1.0 / jnp.sqrt(float(fan_in))
        w = jax.random.uniform(kw, (fan_out, fan_in), jnp.float32, -bound, bound)
        b = jax.random.uniform(kb, (fan_out,), jnp.float32, -bound, bound)
        return w, b

    w1, b1 = linear(ks[0], ks[1], L1, L2)
    w2, b2 = linear(ks[2], ks[3], L2, L3)
    w3, b3 = linear(ks[4], ks[5], L3, L4)
    return (w1, b1, w2, b2, w3, b3)


def reference_forward(x, params):
    """Pure-JAX reference matching the PyTorch module, applied per row."""
    w1, b1, w2, b2, w3, b3 = params
    xn = x / jnp.maximum(jnp.linalg.norm(x, axis=-1, keepdims=True), NORM_EPS)
    h = _leaky_relu(xn @ w1.T + b1)
    h = _leaky_relu(h @ w2.T + b2)
    logits = h @ w3.T + b3
    return jax.nn.softmax(logits, axis=-1)


if __name__ == "__main__":
    key = jax.random.PRNGKey(0)
    k_params, k_x = jax.random.split(key)

    params = init_params(k_params)
    w1p, w23p, bp = pack_params(params)   # packed once; reused across calls

    B = 32                                # small batch of rollout states
    x = jax.random.normal(k_x, (B, L1), jnp.float32)

    probs = lunar_lander_reinforce_forward(x, w1p, w23p, bp)
    probs = jax.block_until_ready(probs)

    ref = reference_forward(x, params)
    assert probs.shape == (B, L4)
    assert jnp.allclose(probs, ref, atol=1e-5, rtol=1e-4), (probs, ref)
    assert jnp.allclose(jnp.sum(probs, axis=-1), 1.0, atol=1e-5)

    # single-state path == original nn.Module forward on one (8,) state
    p1 = jax.block_until_ready(lunar_lander_reinforce_forward(x[:1], w1p, w23p, bp))[0]
    assert jnp.allclose(p1, ref[0], atol=1e-5, rtol=1e-4)

    print("KERNEL_OK")
</pallas_src>

<mosaic_0001>
module attributes {stable_mosaic.version = 11 : i64} {
  func.func @reinforce_net_kernel(%arg0: i32, %arg1: memref<16x8xf32, #tpu.memory_space<vmem>>, %arg2: memref<8x128xf32, #tpu.memory_space<vmem>>, %arg3: memref<128x128xf32, #tpu.memory_space<vmem>>, %arg4: memref<8x128xf32, #tpu.memory_space<vmem>>, %arg5: memref<16x4xf32, #tpu.memory_space<vmem>>) attributes {dimension_semantics = [#tpu.dimension_semantics<parallel>], iteration_bounds = array<i64: 2>, scalar_prefetch = 0 : i64, scratch_operands = 0 : i64, tpu.core_type = #tpu.core_type<tc>, window_params = [{transform_indices = @transform_0, window_bounds = array<i64: 16, 8>}, {pipeline_mode = #tpu.pipeline_mode<synchronous>, transform_indices = @transform_1, window_bounds = array<i64: 8, 128>}, {pipeline_mode = #tpu.pipeline_mode<synchronous>, transform_indices = @transform_2, window_bounds = array<i64: 128, 128>}, {pipeline_mode = #tpu.pipeline_mode<synchronous>, transform_indices = @transform_3, window_bounds = array<i64: 8, 128>}, {transform_indices = @transform_4, window_bounds = array<i64: 16, 4>}]} {
    %c0 = arith.constant 0 : index
    %c0_0 = arith.constant 0 : index
    %0 = vector.load %arg1[%c0, %c0_0] : memref<16x8xf32, #tpu.memory_space<vmem>>, vector<16x8xf32>
    %c0_1 = arith.constant 0 : index
    %c0_2 = arith.constant 0 : index
    %1 = vector.load %arg2[%c0_1, %c0_2] : memref<8x128xf32, #tpu.memory_space<vmem>>, vector<8x128xf32>
    %c0_3 = arith.constant 0 : index
    %c0_4 = arith.constant 0 : index
    %2 = vector.load %arg3[%c0_3, %c0_4] : memref<128x128xf32, #tpu.memory_space<vmem>>, vector<128x128xf32>
    %c0_5 = arith.constant 0 : index
    %c0_6 = arith.constant 0 : index
    %3 = vector.load %arg4[%c0_5, %c0_6] : memref<8x128xf32, #tpu.memory_space<vmem>>, vector<8x128xf32>
    %4 = arith.mulf %0, %0 : vector<16x8xf32>
    %cst = arith.constant dense<0.000000e+00> : vector<16xf32>
    %5 = vector.multi_reduction <add>, %4, %cst [1] : vector<16x8xf32> to vector<16xf32>
    %6 = vector.shape_cast %5 : vector<16xf32> to vector<16x1xf32>
    %cst_7 = arith.constant 1.000000e-24 : f32
    %7 = vector.broadcast %cst_7 : f32 to vector<16x1xf32>
    %8 = arith.maximumf %6, %7 : vector<16x1xf32>
    %9 = math.rsqrt %8 : vector<16x1xf32>
    %10 = vector.broadcast %9 : vector<16x1xf32> to vector<16x8xf32>
    %11 = arith.mulf %0, %10 : vector<16x8xf32>
    %12 = vector.extract_strided_slice %3 {offsets = [0, 0], sizes = [1, 128], strides = [1, 1]} : vector<8x128xf32> to vector<1x128xf32>
    %13 = vector.extract_strided_slice %3 {offsets = [1, 0], sizes = [1, 128], strides = [1, 1]} : vector<8x128xf32> to vector<1x128xf32>
    %14 = vector.extract_strided_slice %3 {offsets = [2, 0], sizes = [1, 128], strides = [1, 1]} : vector<8x128xf32> to vector<1x128xf32>
    %cst_8 = arith.constant dense<0.000000e+00> : vector<16x128xf32>
    %15 = tpu.matmul %11, %1, %cst_8 {dimension_numbers = #tpu.dot_dimension_numbers<[1], [0], [0], [1], [0, 0, 1, 1], [], []>} : vector<16x8xf32>, vector<8x128xf32>, vector<16x128xf32> -> vector<16x128xf32>
    %16 = vector.broadcast %12 : vector<1x128xf32> to vector<16x128xf32>
    %17 = arith.addf %15, %16 : vector<16x128xf32>
    %cst_9 = arith.constant 0.000000e+00 : f32
    %18 = vector.broadcast %cst_9 : f32 to vector<16x128xf32>
    %19 = arith.cmpf ogt, %17, %18 : vector<16x128xf32>
    %cst_10 = arith.constant 0.00999999977 : f32
    %20 = vector.broadcast %cst_10 : f32 to vector<16x128xf32>
    %21 = arith.mulf %20, %17 : vector<16x128xf32>
    %22 = arith.select %19, %17, %21 : vector<16x128xi1>, vector<16x128xf32>
    %cst_11 = arith.constant dense<0.000000e+00> : vector<16x128xf32>
    %23 = tpu.matmul %22, %2, %cst_11 {dimension_numbers = #tpu.dot_dimension_numbers<[1], [0], [0], [1], [0, 0, 1, 1], [], []>} : vector<16x128xf32>, vector<128x128xf32>, vector<16x128xf32> -> vector<16x128xf32>
    %24 = vector.broadcast %13 : vector<1x128xf32> to vector<16x128xf32>
    %25 = arith.addf %23, %24 : vector<16x128xf32>
    %cst_12 = arith.constant 0.000000e+00 : f32
    %26 = vector.broadcast %cst_12 : f32 to vector<16x128xf32>
    %27 = arith.cmpf ogt, %25, %26 : vector<16x128xf32>
    %cst_13 = arith.constant 0.00999999977 : f32
    %28 = vector.broadcast %cst_13 : f32 to vector<16x128xf32>
    %29 = arith.mulf %28, %25 : vector<16x128xf32>
    %30 = arith.select %27, %25, %29 : vector<16x128xi1>, vector<16x128xf32>
    %cst_14 = arith.constant dense<0.000000e+00> : vector<16x128xf32>
    %31 = tpu.matmul %30, %2, %cst_14 {dimension_numbers = #tpu.dot_dimension_numbers<[1], [0], [0], [1], [0, 0, 1, 1], [], []>} : vector<16x128xf32>, vector<128x128xf32>, vector<16x128xf32> -> vector<16x128xf32>
    %32 = vector.broadcast %14 : vector<1x128xf32> to vector<16x128xf32>
    %33 = arith.addf %31, %32 : vector<16x128xf32>
    %34 = vector.extract_strided_slice %33 {offsets = [0, 0], sizes = [16, 4], strides = [1, 1]} : vector<16x128xf32> to vector<16x4xf32>
    %cst_15 = arith.constant dense<0xFF800000> : vector<16xf32>
    %35 = vector.multi_reduction <maximumf>, %34, %cst_15 [1] : vector<16x4xf32> to vector<16xf32>
    %36 = vector.shape_cast %35 : vector<16xf32> to vector<16x1xf32>
    %37 = vector.broadcast %36 : vector<16x1xf32> to vector<16x4xf32>
    %38 = arith.subf %34, %37 : vector<16x4xf32>
    %39 = math.exp %38 : vector<16x4xf32>
    %cst_16 = arith.constant dense<0.000000e+00> : vector<16xf32>
    %40 = vector.multi_reduction <add>, %39, %cst_16 [1] : vector<16x4xf32> to vector<16xf32>
    %41 = vector.shape_cast %40 : vector<16xf32> to vector<16x1xf32>
    %42 = vector.broadcast %41 : vector<16x1xf32> to vector<16x4xf32>
    %43 = arith.divf %39, %42 : vector<16x4xf32>
    %c0_17 = arith.constant 0 : index
    %c0_18 = arith.constant 0 : index
    %44 = vector.load %arg5[%c0_17, %c0_18] : memref<16x4xf32, #tpu.memory_space<vmem>>, vector<16x4xf32>
    tpu.vector_store %arg5[%c0_17, %c0_18], %43 {strides = array<i32>} : memref<16x4xf32, #tpu.memory_space<vmem>>, vector<16x4xf32>,
    return
  }
  func.func @transform_0(%arg0: i32) -> (i32, i32) {
    %c0_i32 = arith.constant 0 : i32
    %c0_i32_0 = arith.constant 0 : i32
    return %arg0, %c0_i32 : i32, i32
  }
  func.func @transform_1(%arg0: i32) -> (i32, i32) {
    %c0_i32 = arith.constant 0 : i32
    %c0_i32_0 = arith.constant 0 : i32
    %c0_i32_1 = arith.constant 0 : i32
    return %c0_i32, %c0_i32_0 : i32, i32
  }
  func.func @transform_2(%arg0: i32) -> (i32, i32) {
    %c0_i32 = arith.constant 0 : i32
    %c0_i32_0 = arith.constant 0 : i32
    %c0_i32_1 = arith.constant 0 : i32
    return %c0_i32, %c0_i32_0 : i32, i32
  }
  func.func @transform_3(%arg0: i32) -> (i32, i32) {
    %c0_i32 = arith.constant 0 : i32
    %c0_i32_0 = arith.constant 0 : i32
    %c0_i32_1 = arith.constant 0 : i32
    return %c0_i32, %c0_i32_0 : i32, i32
  }
  func.func @transform_4(%arg0: i32) -> (i32, i32) {
    %c0_i32 = arith.constant 0 : i32
    %c0_i32_0 = arith.constant 0 : i32
    return %arg0, %c0_i32 : i32, i32
  }
}

</mosaic_0001>

<bundles_post_ra>
// kernel: lunar_lander_reinforce_forward.1
= control target key start
LH: loop header
LB: loop body
LE: loop exit
PB: predicated region body
PF: predicated region fallthrough
CT: control target
= control target key end

     0   :  { %9 = vsyncpa [#allocation3], 0  ;;  %s827_s15 = smov 0   ;;  %s888_s0 = inlined_call_operand.vmem [shape: f32[32,8], index: 0, kind: input, shape index: {}]   ;;  %s889_s1 = inlined_call_operand.vmem [shape: f32[8,128], index: 1, kind: input, shape index: {}]   ;;  %s890_s2 = inlined_call_operand.hbm [shape: f32[128,128], index: 2, kind: input, shape index: {}]   ;;  %s891_s3 = inlined_call_operand.vmem [shape: f32[8,128], index: 3, kind: input, shape index: {}]   ;;  %s892_s4 = inlined_call_operand.vmem [shape: f32[32,4], index: 4, kind: output, shape index: {}]  }
   0x1 LB: > { %s599_s16 = sadd.s32 4294967295, %s797_s15   ;;  %p601_p0 = scmp.ge.s32.totalorder %s797_s15, 1  ;;  %s797_s15 = sphi %s827_s15, %s15_s15  }
   0x2   : > { %p135_p1 = scmp.lt.s32.totalorder %s797_s15, 3  ;;  %s799_s17 = smov [#allocation2]  }
   0x3   : > { %s150_s18 = sshll.u32 %s799_s17, 4  ;;  %p839_p3 = scmp.eq.s32.totalorder %s599_s16, 0  ;;  %s151_s18 = int_to_ptr.vmem [resolvable:$true] %s150_s18 }
   0x4   : > { %p835_p2 = pnand %p601_p0, %p135_p1  ;;  %s772_s21 = scalar_lea.vmem %s151_s18, 2048 }
   0x5   : > { %p773_p7 = scmp.ne.s32.totalorder %s151_s18, %s772_s21  ;;  %p780_p10 = scmp.lt.s32.totalorder %s151_s18, %s151_s18 }
   0x6   : > { %p732_p4 = pneg %p835_p2  ;;  %p781_p11 = scmp.lt.s32.totalorder %s772_s21, %s772_s21 }
   0x8   : > { %p733_p5 = pnand %p839_p3, %p732_p4  ;;  %p782_p12 = por %p781_p11, %p780_p10 }
   0xa   : > { %p763_p6 = pneg %p733_p5 }
   0xc   : > { %p775_p8 = pnand %p773_p7, %p763_p6 }
   0xe   : > { %p776_p9 = pneg %p775_p8 }
  0x10   : > { %p783_p13 = pnand %p782_p12, %p776_p9 }
  0x12   : > { %786 = shalt.err (!%p783_p13)
}
  0x13   : > { %s800_s22 = smov 128   ;;  %s801_s23 = smov 8  }
  0x14   : > { %735 = dma.hbm_to_vmem [thread:$0]  (!%p733_p5), %s890_s2, 2048, %s151_s18, [#allocation3], %s800_s22, %s800_s22, %s801_s23  }
  0x15   : > { %178 = sbr.rel (%p835_p2) target bundleno = 1113 (0x459), region = 36 }
  0x1a   : > { %792 = dma.done.wait (%p839_p3), [#allocation3], 2048  }
  0x1b   : > { %794 = vsyncadd (%p839_p3), [#allocation3], 4294965248  ;;  %s606_s26 = sshll.u32 %s599_s16, 1  ;;  %vm238_vm0 = vcmask 64512   ;;  %v218_v6 = vld [vmem:[%s889_s1] sm:$0xff]  ;;  %v234_v7 = vld [vmem:[#allocation2 + $0x78] sm:$0xff]  ;;  %v251_v31 = vlaneseq }
  0x1c   : > { %p205_p0 = scmp.lt.s32.totalorder %s606_s26, 3  ;;  %653 = vmatprep.subr.mxu0 %v218_v6  ;;  %v233_v8 = vld [vmem:[#allocation2 + $0x70] sm:$0xff]  ;;  %658 = vmatprep.subr.mxu1 %v234_v7  ;;  %v232_v9 = vld [vmem:[#allocation2 + $0x68] sm:$0xff]  ;;  %v231_v10 = vld [vmem:[#allocation2 + $0x60] sm:$0xff]  ;;  %vm506_vm5 = vcmask 31744  }
  0x1d   : > { %654 = vmatpush3.msra.mxu0 %v218_v6  ;;  %659 = vmatpush3.msra.mxu1 %v234_v7  ;;  %v230_v11 = vld [vmem:[#allocation2 + $0x58] sm:$0xff]  ;;  %v229_v12 = vld [vmem:[#allocation2 + $0x50] sm:$0xff]  ;;  %v228_v13 = vld [vmem:[#allocation2 + $0x48] sm:$0xff]  ;;  %v252_v32 = vshrl.u32 %v251_v31, 7 }
  0x1e   : > { %s896_s26 = smov (!%p205_p0, %s606_s26), 3  ;;  %693 = vmatprep.subr.mxu0 %v234_v7  ;;  %660 = vmatprep.subr.mxu1 %v233_v8  ;;  %v227_v14 = vld [vmem:[#allocation2 + $0x40] sm:$0xff]  ;;  %v226_v15 = vld [vmem:[#allocation2 + $0x38] sm:$0xff]  ;;  %v225_v16 = vld [vmem:[#allocation2 + $0x30] sm:$0xff] }
  0x1f   : > { %s607_s27 = sshll.u32 %s896_s26, 3  ;;  %661 = vmatpush3.msra.mxu1 %v233_v8  ;;  %v224_v17 = vld [vmem:[#allocation2 + $0x28] sm:$0xff]  ;;  %v223_v18 = vld [vmem:[#allocation2 + $0x20] sm:$0xff]  ;;  %v222_v27 = vld [vmem:[#allocation2 + $0x18] sm:$0xff]  ;;  %v253_v33 = vsub.s32 0, %v252_v32  ;;  %v344_v44 = vsub.s32 1, %v252_v32 }
  0x20   : > { %s208_s30 = scalar_lea.vmem %s888_s0, %s607_s27  ;;  %662 = vmatprep.subr.mxu1 %v232_v9  ;;  %v221_v28 = vld [vmem:[#allocation2 + $0x10] sm:$0xff]  ;;  %v220_v29 = vld [vmem:[#allocation2 + $0x8] sm:$0xff]  ;;  %v219_v30 = vld [vmem:[#allocation2] sm:$0xff]  ;;  %v429_v54 = vsub.s32 2, %v252_v32  ;;  %s214_s11 = scalar_lea.vmem %s892_s4, %s607_s27 }
  0x21   : > { %v216_v0 = vld [vmem:[%s208_s30] sm:$0xff]  ;;  %v217_v1 = vld [vmem:[%s208_s30 + $0x8] sm:$0xff]  ;;  %663 = vmatpush3.msra.mxu1 %v232_v9 }
  0x22   : > { %v236_v2 = vmul.f32 %v216_v0, %v216_v0  ;;  %v237_v3 = vmul.f32 %v217_v1, %v217_v1  ;;  %664 = vmatprep.subr.mxu1 %v231_v10  ;;  %v235_v34 = vld [vmem:[%s891_s3] sm:$0xff] }
  0x23   : > { %665 = vmatpush3.msra.mxu1 %v231_v10  ;;  %v254_v35 = vrot.slane %v235_v34, %v253_v33  ;;  %v345_v45 = vrot.slane %v235_v34, %v344_v44  ;;  %v430_v56 = vrot.slane %v235_v34, %v429_v54 }
  0x24   : > { %v239_v4 = vsel %vm238_vm0, %v236_v2, 0.0  ;;  %v242_v5 = vsel %vm238_vm0, %v237_v3, 0.0  ;;  %666 = vmatprep.subr.mxu1 %v230_v11 }
  0x25   : > { %240 = vadd.xlane.f32.xlu0 %v239_v4  ;;  %667 = vmatpush3.msra.mxu1 %v230_v11 }
  0x26   : > { %668 = vmatprep.subr.mxu1 %v229_v12 }
  0x27   : > { %669 = vmatpush3.msra.mxu1 %v229_v12 }
  0x28   : > { %670 = vmatprep.subr.mxu1 %v228_v13 }
  0x29   : > { %243 = vadd.xlane.f32.xlu0 %v242_v5  ;;  %671 = vmatpush3.msra.mxu1 %v228_v13 }
  0x2a   : > { %672 = vmatprep.subr.mxu1 %v227_v14 }
  0x2b   : > { %673 = vmatpush3.msra.mxu1 %v227_v14 }
  0x2c   : > { %674 = vmatprep.subr.mxu1 %v226_v15 }
  0x2d   : > { %675 = vmatpush3.msra.mxu1 %v226_v15 }
  0x2e   : > { %676 = vmatprep.subr.mxu1 %v225_v16 }
  0x2f   : > { %677 = vmatpush3.msra.mxu1 %v225_v16 }
  0x30   : > { %678 = vmatprep.subr.mxu1 %v224_v17 }
  0x31   : > { %679 = vmatpush3.msra.mxu1 %v224_v17 }
  0x32   : > { %680 = vmatprep.subr.mxu1 %v223_v18 }
  0x33   : > { %681 = vmatpush3.msra.mxu1 %v223_v18 }
  0x34   : > { %682 = vmatprep.subr.mxu1 %v222_v27 }
  0x35   : > { %683 = vmatpush3.msra.mxu1 %v222_v27 }
  0x36   : > { %684 = vmatprep.subr.mxu1 %v221_v28 }
  0x37   : > { %685 = vmatpush3.msra.mxu1 %v221_v28 }
  0x38   : > { %686 = vmatprep.subr.mxu1 %v220_v29 }
  0x39   : > { %687 = vmatpush3.msra.mxu1 %v220_v29 }
  0x3a   : > { %688 = vmatprep.subr.mxu1 %v219_v30 }
  0x3b   : > { %689 = vmatpush3.msra.mxu1 %v219_v30 }
  0xae   : > { %v241_v19 = vpop.xlane.xlu0 %240 }
  0xaf   : > { %v245_v20 = vmax.f32 %v241_v19, 1e-24 }
  0xb1   : > { %749 = vrsqrt.f32 %v245_v20 }
  0xb2   : > { %v244_v21 = vpop.xlane.xlu0 %243 }
  0xb3   : > { %v246_v22 = vmax.f32 %v244_v21, 1e-24 }
  0xb5   : > { %751 = vrsqrt.f32 %v246_v22 }
  0xbe   : > { %v750_v23 = vpop.eup %749 }
  0xbf   : > { %v249_v24 = vmul.f32 %v750_v23, %v216_v0 }
  0xc1   : > { %655 = vmatprep.mubr.msk.f32.mxu0 %vm238_vm0, %v249_v24 }
  0xc2   : > { %v752_v25 = vpop.eup %751 }
  0xc3   : > { %v250_v26 = vmul.f32 %v752_v25, %v217_v1 }
  0xc5   : > { %656 = vmatmul.mubr.msk.f32.vlgmr.msra.gmra.mxu0 %vm238_vm0, %v250_v26 }
  0xc6   : > { %694 = vmatpush3.msra.mxu0 %v234_v7 }
  0xc7   : > { %695 = vmatprep.subr.mxu0 %v233_v8 }
  0xc8   : > { %696 = vmatpush3.msra.mxu0 %v233_v8 }
  0xc9   : > { %697 = vmatprep.subr.mxu0 %v232_v9 }
  0xca   : > { %698 = vmatpush3.msra.mxu0 %v232_v9 }
  0xcb   : > { %699 = vmatprep.subr.mxu0 %v231_v10 }
  0xcc   : > { %700 = vmatpush3.msra.mxu0 %v231_v10 }
  0xcd   : > { %701 = vmatprep.subr.mxu0 %v230_v11 }
  0xce   : > { %702 = vmatpush3.msra.mxu0 %v230_v11 }
  0xcf   : > { %703 = vmatprep.subr.mxu0 %v229_v12 }
  0xd0   : > { %704 = vmatpush3.msra.mxu0 %v229_v12 }
  0xd1   : > { %705 = vmatprep.subr.mxu0 %v228_v13 }
  0xd2   : > { %706 = vmatpush3.msra.mxu0 %v228_v13 }
  0xd3   : > { %707 = vmatprep.subr.mxu0 %v227_v14 }
  0xd4   : > { %708 = vmatpush3.msra.mxu0 %v227_v14 }
  0xd5   : > { %709 = vmatprep.subr.mxu0 %v226_v15 }
  0xd6   : > { %710 = vmatpush3.msra.mxu0 %v226_v15 }
  0xd7   : > { %711 = vmatprep.subr.mxu0 %v225_v16 }
  0xd8   : > { %712 = vmatpush3.msra.mxu0 %v225_v16 }
  0xd9   : > { %713 = vmatprep.subr.mxu0 %v224_v17 }
  0xda   : > { %714 = vmatpush3.msra.mxu0 %v224_v17 }
  0xdb   : > { %715 = vmatprep.subr.mxu0 %v223_v18 }
  0xdc   : > { %716 = vmatpush3.msra.mxu0 %v223_v18 }
  0xdd   : > { %717 = vmatprep.subr.mxu0 %v222_v27 }
  0xde   : > { %718 = vmatpush3.msra.mxu0 %v222_v27 }
  0xdf   : > { %719 = vmatprep.subr.mxu0 %v221_v28 }
  0xe0   : > { %720 = vmatpush3.msra.mxu0 %v221_v28 }
  0xe1   : > { %721 = vmatprep.subr.mxu0 %v220_v29 }
  0xe2   : > { %722 = vmatpush3.msra.mxu0 %v220_v29 }
  0xe3   : > { %723 = vmatprep.subr.mxu0 %v219_v30 }
  0xe4   : > { %724 = vmatpush3.msra.mxu0 %v219_v30 }
 0x185   : > { %v657_v36 = vpop.f32.mrf.mxu0 }
 0x186   : > { %v333_v37 = vadd.f32 %v657_v36, %v254_v35 }
 0x187   : > { %v327_v38 = vpop.f32.mrf.mxu0 }
 0x188   : > { %v328_v39 = vadd.f32 %v327_v38, %v254_v35  ;;  %v339_v40 = vmul.f32 0.01, %v333_v37  ;;  %vm337_vm2 = vcmp.gt.f32.partialorder %v333_v37, 0.0 }
 0x18a   : > { %vm336_vm1 = vcmp.gt.f32.partialorder %v328_v39, 0.0  ;;  %v338_v41 = vmul.f32 0.01, %v328_v39  ;;  %v341_v43 = vsel %vm337_vm2, %v333_v37, %v339_v40 }
 0x18c   : > { %v340_v42 = vsel %vm336_vm1, %v328_v39, %v338_v41 }
 0x18d   : > { %690 = vmatprep.mubr.f32.mxu1 %v340_v42 }
 0x18e   : > { %691 = vmatmul.mubr.f32.vlgmr.msra.gmra.mxu1 %v341_v43 }
 0x24e   : > { %v692_v46 = vpop.f32.mrf.mxu1 }
 0x24f   : > { %v418_v47 = vadd.f32 %v692_v46, %v345_v45 }
 0x250   : > { %v412_v48 = vpop.f32.mrf.mxu1 }
 0x251   : > { %v413_v49 = vadd.f32 %v412_v48, %v345_v45  ;;  %v424_v50 = vmul.f32 0.01, %v418_v47  ;;  %vm422_vm3 = vcmp.gt.f32.partialorder %v418_v47, 0.0 }
 0x253   : > { %v423_v51 = vmul.f32 0.01, %v413_v49  ;;  %vm421_vm4 = vcmp.gt.f32.partialorder %v413_v49, 0.0  ;;  %v426_v53 = vsel %vm422_vm3, %v418_v47, %v424_v50 }
 0x255   : > { %v425_v52 = vsel %vm421_vm4, %v413_v49, %v423_v51 }
 0x256   : > { %725 = vmatprep.mubr.f32.mxu0 %v425_v52 }
 0x257   : > { %726 = vmatmul.mubr.f32.vlgmr.msra.gmra.mxu0 %v426_v53 }
 0x317   : > { %v727_v55 = vpop.f32.mrf.mxu0 }
 0x318   : > { %v503_v59 = vadd.f32 %v727_v55, %v430_v56 }
 0x319   : > { %v497_v57 = vpop.f32.mrf.mxu0 }
 0x31a   : > { %v498_v58 = vadd.f32 %v497_v57, %v430_v56  ;;  %v510_v61 = vsel %vm506_vm5, %v503_v59, -inf }
 0x31c   : > { %v507_v60 = vsel %vm506_vm5, %v498_v58, -inf }
 0x31d   : > { %508 = vmax.xlane.f32.xlu1 %v507_v60 }
 0x321   : > { %511 = vmax.xlane.f32.xlu1 %v510_v61 }
 0x3a6   : > { %v509_v62 = vpop.xlane.xlu1 %508 }
 0x3a7   : > { %v513_v63 = vsub.f32 %v498_v58, %v509_v62 }
 0x3a9   : > { %v515_v0 = vmul.f32 1.442695, %v513_v63 }
 0x3aa   : > { %v512_v1 = vpop.xlane.xlu1 %511 }
 0x3ab   : > { %753 = vpow2.f32 %v515_v0  ;;  %v514_v2 = vsub.f32 %v503_v59, %v512_v1 }
 0x3ad   : > { %v517_v3 = vmul.f32 1.442695, %v514_v2 }
 0x3af   : > { %755 = vpow2.f32 %v517_v3 }
 0x3b8   : > { %v754_v4 = vpop.eup %753 }
 0x3b9   : > { %v519_v5 = vsel %vm506_vm5, %v754_v4, 0.0 }
 0x3ba   : > { %520 = vadd.xlane.f32.xlu0 %v519_v5 }
 0x3bc   : > { %v756_v6 = vpop.eup %755 }
 0x3bd   : > { %v522_v7 = vsel %vm506_vm5, %v756_v6, 0.0 }
 0x3be   : > { %523 = vadd.xlane.f32.xlu1 %v522_v7 }
 0x443   : > { %v521_v8 = vpop.xlane.xlu0 %520 }
 0x444   : > { %757 = vrcp.f32 %v521_v8 }
 0x447   : > { %v524_v9 = vpop.xlane.xlu1 %523 }
 0x448   : > { %759 = vrcp.f32 %v524_v9 }
 0x451   : > { %v758_v10 = vpop.eup %757 }
 0x452   : > { %v526_v11 = vmul.f32 %v758_v10, %v754_v4 }
 0x454   : > { %529 = vst.msk [vmem:[%s214_s11] sm:$0xff] %vm506_vm5, %v526_v11 }
 0x455   : > { %v760_v12 = vpop.eup %759 }
 0x456   : > { %v528_v13 = vmul.f32 %v760_v12, %v756_v6 }
 0x458   : > { %530 = vst.msk [vmem:[%s214_s11 + $0x8] sm:$0xff] %vm506_vm5, %v528_v13 }
 0x459 PF: > { %s15_s15 = sadd.s32 1, %s797_s15  }
 0x45a   : > { %p12_p1 = scmp.ge.s32.totalorder %s15_s15, 4  }
 0x45c   :  { %14 = sbr.rel (!%p12_p1) target bundleno = 1 (0x1), region = 71 }
 0x461   :  { %553 = vsyncpa [#allocation3], 1 }
 0x462   :  { %555 = vsyncpa [#allocation3 + $0x1], 1 }

</bundles_post_ra>
